<compile_context>
chip_gen: v6e
topology: v6e:2x2x1
jax: 0.10.0
libtpu: 0.0.40
codegen_flags: <defaults>
</compile_context>

<pallas_src>
import jax
import jax.numpy as jnp
from jax.experimental import pallas as pl
from jax.experimental.pallas import tpu as pltpu

_LANE = 128
_SUBLANE = 8


def _round_up(x, m):
    return (x + m - 1) // m * m


def _transfer_net_kernel(x_ref, w_pre_ref, b_pre_ref, w_last_ref, b_last_ref, o_ref):
    # pre_layers (synthetic Linear): hidden = x @ W_pre + b_pre    (BM, 1024)
    # MXU operands in bf16, f32 accumulation; bias added in f32.
    x_bf = x_ref[...].astype(jnp.bfloat16)
    hidden = jnp.dot(x_bf, w_pre_ref[...], preferred_element_type=jnp.float32)
    hidden = hidden + b_pre_ref[...]                   # (1, 1024) bias row
    # last_layer: out = hidden @ W_last + b_last                    (BM, 128)
    out = jnp.dot(hidden.astype(jnp.bfloat16), w_last_ref[...],
                  preferred_element_type=jnp.float32)
    out = out + b_last_ref[...]
    o_ref[...] = out.astype(o_ref.dtype)               # lane-dense 128-wide store


def transfer_net_forward(x, w_pre, b_pre, w_last, b_last):
    """x: (B, F) f32; w_pre: (F, 1000); b_pre: (1000,); w_last: (1000, 17); b_last: (17,)."""
    B, F = x.shape
    hid = w_pre.shape[1]
    out_dim = w_last.shape[1]

    hid_pad = _round_up(hid, _LANE)                    # 1000 -> 1024
    out_pad = _round_up(max(out_dim, _LANE), _LANE)    # 17   -> 128

    # Batch tile: large tiles for real batches, minimal sublane-aligned tile for
    # toy batches. Weights are small enough to stay VMEM-resident on every
    # generation (incl. v7x's 64 MiB) at these tile sizes.
    if B >= 256:
        bm = 256
    elif B >= 128:
        bm = 128
    else:
        bm = _round_up(B, _SUBLANE)
    b_pad = _round_up(B, bm)

    # Zero-pad lane dims. Padded w_pre cols, w_last rows/cols and bias tails are
    # zero, so padded output lanes are exactly zero and are sliced off below.
    x_p = jnp.zeros((b_pad, F), jnp.float32).at[:B].set(x)
    w_pre_p = (jnp.zeros((F, hid_pad), jnp.bfloat16)
               .at[:, :hid].set(w_pre.astype(jnp.bfloat16)))
    b_pre_p = jnp.zeros((1, hid_pad), jnp.float32).at[:, :hid].set(b_pre.reshape(1, -1))
    w_last_p = (jnp.zeros((hid_pad, out_pad), jnp.bfloat16)
                .at[:hid, :out_dim].set(w_last.astype(jnp.bfloat16)))
    b_last_p = jnp.zeros((1, out_pad), jnp.float32).at[:, :out_dim].set(b_last.reshape(1, -1))

    grid = (b_pad // bm,)

    flops = 2 * b_pad * F * hid_pad + 2 * b_pad * hid_pad * out_pad
    bytes_accessed = (x_p.size * 4 + w_pre_p.size * 2 + w_last_p.size * 2
                      + b_pre_p.size * 4 + b_last_p.size * 4 + b_pad * out_pad * 4)

    out_padded = pl.pallas_call(
        _transfer_net_kernel,
        out_shape=jax.ShapeDtypeStruct((b_pad, out_pad), jnp.float32),
        grid_spec=pltpu.PrefetchScalarGridSpec(
            num_scalar_prefetch=0,
            grid=grid,
            in_specs=[
                pl.BlockSpec((bm, F), lambda i: (i, 0)),          # batch tile of x
                pl.BlockSpec((F, hid_pad), lambda i: (0, 0)),     # W_pre (resident)
                pl.BlockSpec((1, hid_pad), lambda i: (0, 0)),     # b_pre row
                pl.BlockSpec((hid_pad, out_pad), lambda i: (0, 0)),  # W_last (resident)
                pl.BlockSpec((1, out_pad), lambda i: (0, 0)),     # b_last row
            ],
            out_specs=pl.BlockSpec((bm, out_pad), lambda i: (i, 0)),
        ),
        compiler_params=pltpu.CompilerParams(
            # Batch tiles are independent -> shard across v7x's 2 TensorCores
            # (no-op on v5e/v6e). Default scoped VMEM is ample for these blocks;
            # raise vmem_limit_bytes here if tiles are grown for a real backbone.
            dimension_semantics=("parallel",),
        ),
        cost_estimate=pl.CostEstimate(
            flops=flops, transcendentals=0, bytes_accessed=bytes_accessed),
    )(x_p, w_pre_p, b_pre_p, w_last_p, b_last_p)

    return out_padded[:B, :out_dim]


def _ref_forward(x, w_pre, b_pre, w_last, b_last):
    h = x @ w_pre + b_pre
    return h @ w_last + b_last


if __name__ == "__main__":
    key = jax.random.PRNGKey(0)
    k_x, k_wp, k_bp, k_wl, k_bl = jax.random.split(key, 5)

    batch = 8
    feat_dim = 64          # input feature dim fed to the synthetic backbone
    input_dim = 1000       # TransferNet default: backbone output / last_layer input
    output_dim = 17        # TransferNet default

    x = jax.random.normal(k_x, (batch, feat_dim), dtype=jnp.float32)

    # Deterministic parameter init (small uniform, PyTorch-Linear-style scale).
    w_pre = jax.random.uniform(k_wp, (feat_dim, input_dim), jnp.float32,
                               minval=-1.0, maxval=1.0) / jnp.sqrt(feat_dim)
    b_pre = jax.random.uniform(k_bp, (input_dim,), jnp.float32,
                               minval=-1.0, maxval=1.0) / jnp.sqrt(feat_dim)
    w_last = jax.random.uniform(k_wl, (input_dim, output_dim), jnp.float32,
                                minval=-1.0, maxval=1.0) / jnp.sqrt(input_dim)
    b_last = jax.random.uniform(k_bl, (output_dim,), jnp.float32,
                                minval=-1.0, maxval=1.0) / jnp.sqrt(input_dim)

    out = transfer_net_forward(x, w_pre, b_pre, w_last, b_last)
    out = jax.block_until_ready(out)

    ref = _ref_forward(x, w_pre, b_pre, w_last, b_last)
    assert out.shape == (batch, output_dim), out.shape
    # bf16 MXU operands with f32 accumulation -> compare against f32 reference
    # with a tolerance matching bf16 mantissa precision.
    max_err = float(jnp.max(jnp.abs(out - ref)))
    assert jnp.allclose(out, ref, atol=2e-2, rtol=2e-2), max_err

    print("KERNEL_OK")
</pallas_src>

<mosaic_0001>
module attributes {stable_mosaic.version = 11 : i64} {
  func.func @_transfer_net_kernel(%arg0: i32, %arg1: memref<8x64xf32, #tpu.memory_space<vmem>>, %arg2: memref<64x1024xbf16, #tpu.memory_space<vmem>>, %arg3: memref<1x1024xf32, #tpu.memory_space<vmem>>, %arg4: memref<1024x128xbf16, #tpu.memory_space<vmem>>, %arg5: memref<1x128xf32, #tpu.memory_space<vmem>>, %arg6: memref<8x128xf32, #tpu.memory_space<vmem>>) attributes {dimension_semantics = [#tpu.dimension_semantics<parallel>], iteration_bounds = array<i64: 1>, scalar_prefetch = 0 : i64, scratch_operands = 0 : i64, tpu.core_type = #tpu.core_type<tc>, window_params = [{transform_indices = @transform_0, window_bounds = array<i64: 8, 64>}, {pipeline_mode = #tpu.pipeline_mode<synchronous>, transform_indices = @transform_1, window_bounds = array<i64: 64, 1024>}, {pipeline_mode = #tpu.pipeline_mode<synchronous>, transform_indices = @transform_2, window_bounds = array<i64: 1, 1024>}, {pipeline_mode = #tpu.pipeline_mode<synchronous>, transform_indices = @transform_3, window_bounds = array<i64: 1024, 128>}, {pipeline_mode = #tpu.pipeline_mode<synchronous>, transform_indices = @transform_4, window_bounds = array<i64: 1, 128>}, {transform_indices = @transform_5, window_bounds = array<i64: 8, 128>}]} {
    %c0 = arith.constant 0 : index
    %c0_0 = arith.constant 0 : index
    %0 = vector.load %arg1[%c0, %c0_0] : memref<8x64xf32, #tpu.memory_space<vmem>>, vector<8x64xf32>
    %1 = arith.truncf %0 : vector<8x64xf32> to vector<8x64xbf16>
    %c0_1 = arith.constant 0 : index
    %c0_2 = arith.constant 0 : index
    %2 = vector.load %arg2[%c0_1, %c0_2] : memref<64x1024xbf16, #tpu.memory_space<vmem>>, vector<64x1024xbf16>
    %cst = arith.constant dense<0.000000e+00> : vector<8x1024xf32>
    %3 = tpu.matmul %1, %2, %cst {dimension_numbers = #tpu.dot_dimension_numbers<[1], [0], [0], [1], [0, 0, 1, 1], [], []>} : vector<8x64xbf16>, vector<64x1024xbf16>, vector<8x1024xf32> -> vector<8x1024xf32>
    %c0_3 = arith.constant 0 : index
    %c0_4 = arith.constant 0 : index
    %4 = vector.load %arg3[%c0_3, %c0_4] : memref<1x1024xf32, #tpu.memory_space<vmem>>, vector<1x1024xf32>
    %5 = vector.broadcast %4 : vector<1x1024xf32> to vector<8x1024xf32>
    %6 = arith.addf %3, %5 : vector<8x1024xf32>
    %7 = arith.truncf %6 : vector<8x1024xf32> to vector<8x1024xbf16>
    %c0_5 = arith.constant 0 : index
    %c0_6 = arith.constant 0 : index
    %8 = vector.load %arg4[%c0_5, %c0_6] : memref<1024x128xbf16, #tpu.memory_space<vmem>>, vector<1024x128xbf16>
    %cst_7 = arith.constant dense<0.000000e+00> : vector<8x128xf32>
    %9 = tpu.matmul %7, %8, %cst_7 {dimension_numbers = #tpu.dot_dimension_numbers<[1], [0], [0], [1], [0, 0, 1, 1], [], []>} : vector<8x1024xbf16>, vector<1024x128xbf16>, vector<8x128xf32> -> vector<8x128xf32>
    %c0_8 = arith.constant 0 : index
    %c0_9 = arith.constant 0 : index
    %10 = vector.load %arg5[%c0_8, %c0_9] : memref<1x128xf32, #tpu.memory_space<vmem>>, vector<1x128xf32>
    %11 = vector.broadcast %10 : vector<1x128xf32> to vector<8x128xf32>
    %12 = arith.addf %9, %11 : vector<8x128xf32>
    %c0_10 = arith.constant 0 : index
    %c0_11 = arith.constant 0 : index
    %13 = vector.load %arg6[%c0_10, %c0_11] : memref<8x128xf32, #tpu.memory_space<vmem>>, vector<8x128xf32>
    tpu.vector_store %arg6[%c0_10, %c0_11], %12 {strides = array<i32>} : memref<8x128xf32, #tpu.memory_space<vmem>>, vector<8x128xf32>,
    return
  }
  func.func @transform_0(%arg0: i32) -> (i32, i32) {
    %c0_i32 = arith.constant 0 : i32
    %c0_i32_0 = arith.constant 0 : i32
    return %arg0, %c0_i32 : i32, i32
  }
  func.func @transform_1(%arg0: i32) -> (i32, i32) {
    %c0_i32 = arith.constant 0 : i32
    %c0_i32_0 = arith.constant 0 : i32
    %c0_i32_1 = arith.constant 0 : i32
    return %c0_i32, %c0_i32_0 : i32, i32
  }
  func.func @transform_2(%arg0: i32) -> (i32, i32) {
    %c0_i32 = arith.constant 0 : i32
    %c0_i32_0 = arith.constant 0 : i32
    %c0_i32_1 = arith.constant 0 : i32
    return %c0_i32, %c0_i32_0 : i32, i32
  }
  func.func @transform_3(%arg0: i32) -> (i32, i32) {
    %c0_i32 = arith.constant 0 : i32
    %c0_i32_0 = arith.constant 0 : i32
    %c0_i32_1 = arith.constant 0 : i32
    return %c0_i32, %c0_i32_0 : i32, i32
  }
  func.func @transform_4(%arg0: i32) -> (i32, i32) {
    %c0_i32 = arith.constant 0 : i32
    %c0_i32_0 = arith.constant 0 : i32
    %c0_i32_1 = arith.constant 0 : i32
    return %c0_i32, %c0_i32_0 : i32, i32
  }
  func.func @transform_5(%arg0: i32) -> (i32, i32) {
    %c0_i32 = arith.constant 0 : i32
    %c0_i32_0 = arith.constant 0 : i32
    return %arg0, %c0_i32 : i32, i32
  }
}

</mosaic_0001>

<bundles_post_ra>
// kernel: tpu_custom_call.1
= control target key start
LH: loop header
LB: loop body
LE: loop exit
PB: predicated region body
PF: predicated region fallthrough
CT: control target
= control target key end

     0   :  { %10 = vsyncpa [#allocation3], 0  ;;  %s1639_s0 = inlined_call_operand.hbm [shape: f32[8,64], index: 0, kind: input, shape index: {}]   ;;  %s1640_s1 = inlined_call_operand.hbm [shape: bf16[64,1024], index: 1, kind: input, shape index: {}]   ;;  %s1641_s2 = inlined_call_operand.hbm [shape: f32[1,1024], index: 2, kind: input, shape index: {}]   ;;  %s1642_s3 = inlined_call_operand.hbm [shape: bf16[1024,128], index: 3, kind: input, shape index: {}]   ;;  %s1643_s4 = inlined_call_operand.vmem [shape: f32[1,128], index: 4, kind: input, shape index: {}]   ;;  %s1644_s5 = inlined_call_operand.hbm [shape: f32[8,128], index: 5, kind: output, shape index: {}]  }
   0x1   :  { %11 = vsyncpa [#allocation6], 0 }
   0x2   :  { %12 = vsyncpa [#allocation9], 0 }
   0x3   :  { %13 = vsyncpa [#allocation4], 0  ;;  %s1553_s18 = smov [#allocation5]  }
   0x4   :  { %s29_s19 = sshll.u32 %s1553_s18, 4  ;;  %s30_s19 = int_to_ptr.vmem [resolvable:$true] %s29_s19 }
   0x5   :  { %s1453_s20 = scalar_lea.vmem %s30_s19, 4096  ;;  %p1458_p1 = scmp.lt.s32.totalorder %s30_s19, %s30_s19 }
   0x6   :  { %p1454_p0 = scmp.ne.s32.totalorder %s30_s19, %s1453_s20  ;;  %p1459_p2 = scmp.lt.s32.totalorder %s1453_s20, %s1453_s20 }
   0x8   :  { %p1460_p3 = por %p1459_p2, %p1458_p1 }
   0xa   :  { %p1461_p4 = pnand %p1460_p3, %p1454_p0 }
   0xc   :  { %1464 = shalt.err (!%p1461_p4)
}
   0xd   :  { %s1554_s21 = smov 512   ;;  %s1555_s22 = smov 32  }
   0xe   :  { %35 = dma.hbm_to_vmem [thread:$0]  %s1640_s1, 4096, %s30_s19, [#allocation6], %s1554_s21, %s1554_s21, %s1555_s22  }
   0xf   :  { %s1556_s25 = smov [#allocation2]   ;;  %s1557_s27 = smov [#allocation7]  }
  0x10   :  { %s20_s26 = sshll.u32 %s1556_s25, 4  ;;  %s42_s28 = sshll.u32 %s1557_s27, 4  ;;  %s21_s26 = int_to_ptr.vmem [resolvable:$true] %s20_s26  ;;  %s43_s28 = int_to_ptr.vmem [resolvable:$true] %s42_s28 }
  0x11   :  { %s1473_s29 = scalar_lea.vmem %s21_s26, 128  ;;  %p1478_p6 = scmp.lt.s32.totalorder %s21_s26, %s21_s26 }
  0x12   :  { %p1474_p5 = scmp.ne.s32.totalorder %s21_s26, %s1473_s29  ;;  %p1479_p7 = scmp.lt.s32.totalorder %s1473_s29, %s1473_s29 }
  0x14   :  { %p1480_p8 = por %p1479_p7, %p1478_p6 }
  0x16   :  { %p1481_p9 = pnand %p1480_p8, %p1474_p5 }
  0x18   :  { %1484 = shalt.err (!%p1481_p9)
}
  0x19   :  { %23 = dma.hbm_to_vmem [thread:$0]  %s1639_s0, 128, %s21_s26, [#allocation3]  }
  0x1a   :  { %s1493_s7 = scalar_lea.vmem %s43_s28, 128  ;;  %p1498_p11 = scmp.lt.s32.totalorder %s43_s28, %s43_s28 }
  0x1b   :  { %p1494_p10 = scmp.ne.s32.totalorder %s43_s28, %s1493_s7  ;;  %p1499_p12 = scmp.lt.s32.totalorder %s1493_s7, %s1493_s7 }
  0x1d   :  { %p1500_p13 = por %p1499_p12, %p1498_p11 }
  0x1f   :  { %p1501_p0 = pnand %p1500_p13, %p1494_p10 }
  0x21   :  { %1504 = shalt.err (!%p1501_p0)
}
  0x22   :  { %45 = dma.hbm_to_vmem [thread:$0]  %s1641_s2, 128, %s43_s28, [#allocation6]  }
  0x23   :  { %s1558_s9 = smov [#allocation8]  }
  0x24   :  { %s51_s10 = sshll.u32 %s1558_s9, 4  ;;  %s52_s10 = int_to_ptr.vmem [resolvable:$true] %s51_s10 }
  0x25   :  { %s1513_s11 = scalar_lea.vmem %s52_s10, 8192  ;;  %p1518_p2 = scmp.lt.s32.totalorder %s52_s10, %s52_s10 }
  0x26   :  { %p1514_p1 = scmp.ne.s32.totalorder %s52_s10, %s1513_s11  ;;  %p1519_p3 = scmp.lt.s32.totalorder %s1513_s11, %s1513_s11 }
  0x28   :  { %p1520_p4 = por %p1519_p3, %p1518_p2 }
  0x2a   :  { %p1521_p5 = pnand %p1520_p4, %p1514_p1 }
  0x2c   :  { %1524 = shalt.err (!%p1521_p5)
}
  0x2d   :  { %s1559_s0 = smov 64   ;;  %s1560_s12 = smov 4  }
  0x2e   :  { %57 = dma.hbm_to_vmem [thread:$0]  %s1642_s3, 8192, %s52_s10, [#allocation9], %s1559_s0, %s1559_s0, %s1560_s12  }
  0x2f   :  { %1545 = dma.done.wait [#allocation3], 128  }
  0x30   :  { %1546 = vsyncadd [#allocation3], 4294967168 }
  0x31   :  { %1547 = dma.done.wait [#allocation6], 4224  }
  0x32   :  { %1548 = vsyncadd [#allocation6], 4294963072 }
  0x33   :  { %1549 = dma.done.wait [#allocation9], 8192  }
  0x34   :  { %1550 = vsyncadd [#allocation9], 4294959104  ;;  %v1561_v0 = vmov 0   ;;  %v99_v1 = vld [vmem:[#allocation5 + $0xc0] sm:$0xff]  ;;  %v100_v3 = vld [vmem:[#allocation5 + $0xc8] sm:$0xff]  ;;  %vm309_vm0 = vcmask 523264  }
  0x35   :  { %345 = vmatprep.mubr.bf16.mxu0 %v1561_v0  ;;  %386 = vmatprep.mubr.bf16.mxu1 %v1561_v0  ;;  %v103_v2 = vld [vmem:[#allocation5 + $0xe0] sm:$0xff]  ;;  %v104_v5 = vld [vmem:[#allocation5 + $0xe8] sm:$0xff]  ;;  %v73_v31 = vld [vmem:[#allocation2] sm:$0xff]  ;;  %s1562_s15 = smov [#allocation10]  }
  0x36   :  { %v1207_v4 = vcombine.high %v99_v1, %v103_v2  ;;  %v1206_v6 = vcombine.low %v99_v1, %v103_v2  ;;  %v91_v7 = vld [vmem:[#allocation5 + $0x80] sm:$0xff]  ;;  %v1209_v9 = vcombine.high %v100_v3, %v104_v5  ;;  %v1208_v10 = vcombine.low %v100_v3, %v104_v5  ;;  %v92_v12 = vld [vmem:[#allocation5 + $0x88] sm:$0xff]  ;;  %v101_v32 = vld [vmem:[#allocation5 + $0xd0] sm:$0xff]  ;;  %s1171_s16 = sshll.u32 %s1562_s15, 4  ;;  %s1172_s16 = int_to_ptr.vmem [resolvable:$true] %s1171_s16 }
  0x37   :  { %v95_v8 = vld [vmem:[#allocation5 + $0xa0] sm:$0xff]  ;;  %v96_v13 = vld [vmem:[#allocation5 + $0xa8] sm:$0xff]  ;;  %v105_v33 = vld [vmem:[#allocation5 + $0xf0] sm:$0xff]  ;;  %v74_v43 = vpack.c.bf16 %v73_v31, %v73_v31  ;;  %p1530_p7 = scmp.lt.s32.totalorder %s1172_s16, %s1172_s16 }
  0x38   :  { %v1199_v11 = vcombine.high %v91_v7, %v95_v8  ;;  %v83_v14 = vld [vmem:[#allocation5 + $0x40] sm:$0xff]  ;;  %321 = vmatprep.subr.bf16.mxu0 %v1207_v4  ;;  %v1201_v15 = vcombine.high %v92_v12, %v96_v13  ;;  %v84_v17 = vld [vmem:[#allocation5 + $0x48] sm:$0xff]  ;;  %362 = vmatprep.subr.bf16.mxu1 %v1209_v9  ;;  %v1198_v19 = vcombine.low %v91_v7, %v95_v8  ;;  %v102_v34 = vld [vmem:[#allocation5 + $0xd8] sm:$0xff] }
  0x39   :  { %v87_v16 = vld [vmem:[#allocation5 + $0x60] sm:$0xff]  ;;  %v88_v18 = vld [vmem:[#allocation5 + $0x68] sm:$0xff]  ;;  %322 = vmatpush1.bf16.msra.mxu0 %v1206_v6  ;;  %363 = vmatpush1.bf16.msra.mxu1 %v1208_v10  ;;  %v1200_v20 = vcombine.low %v92_v12, %v96_v13  ;;  %v106_v35 = vld [vmem:[#allocation5 + $0xf8] sm:$0xff]  ;;  %v1211_v39 = vcombine.high %v101_v32, %v105_v33  ;;  %v1210_v45 = vcombine.low %v101_v32, %v105_v33 }
  0x3a   :  { %323 = vmatprep.subr.bf16.mxu0 %v1199_v11  ;;  %v1191_v21 = vcombine.high %v83_v14, %v87_v16  ;;  %364 = vmatprep.subr.bf16.mxu1 %v1201_v15  ;;  %v1193_v22 = vcombine.high %v84_v17, %v88_v18  ;;  %v75_v23 = vld [vmem:[#allocation5] sm:$0xff]  ;;  %v76_v25 = vld [vmem:[#allocation5 + $0x8] sm:$0xff]  ;;  %v1190_v27 = vcombine.low %v83_v14, %v87_v16  ;;  %v93_v37 = vld [vmem:[#allocation5 + $0x90] sm:$0xff] }
  0x3b   :  { %v79_v24 = vld [vmem:[#allocation5 + $0x20] sm:$0xff]  ;;  %v80_v26 = vld [vmem:[#allocation5 + $0x28] sm:$0xff]  ;;  %v1192_v28 = vcombine.low %v84_v17, %v88_v18  ;;  %v97_v40 = vld [vmem:[#allocation5 + $0xb0] sm:$0xff]  ;;  %v1213_v41 = vcombine.high %v102_v34, %v106_v35  ;;  %v1212_v47 = vcombine.low %v102_v34, %v106_v35 }
  0x3c   :  { %v1183_v29 = vcombine.high %v75_v23, %v79_v24  ;;  %v1185_v30 = vcombine.high %v76_v25, %v80_v26  ;;  %v1182_v36 = vcombine.low %v75_v23, %v79_v24  ;;  %v1184_v38 = vcombine.low %v76_v25, %v80_v26  ;;  %v94_v42 = vld [vmem:[#allocation5 + $0x98] sm:$0xff]  ;;  %v85_v46 = vld [vmem:[#allocation5 + $0x50] sm:$0xff]  ;;  %v1381_v3 = vld [vmem:[#allocation8 + $0x78] sm:$0xff]  }
  0x3d   :  { %324 = vmatpush1.bf16.msra.mxu0 %v1198_v19  ;;  %365 = vmatpush1.bf16.msra.mxu1 %v1200_v20  ;;  %v98_v44 = vld [vmem:[#allocation5 + $0xb8] sm:$0xff]  ;;  %v1203_v48 = vcombine.high %v93_v37, %v97_v40  ;;  %v89_v49 = vld [vmem:[#allocation5 + $0x70] sm:$0xff]  ;;  %v1202_v53 = vcombine.low %v93_v37, %v97_v40  ;;  %v1382_v5 = vld [vmem:[#allocation8 + $0xf8] sm:$0xff]   ;;  %v109_v37 = vlaneseq }
  0x3e   :  { %325 = vmatprep.subr.bf16.mxu0 %v1191_v21  ;;  %366 = vmatprep.subr.bf16.mxu1 %v1193_v22  ;;  %v1205_v50 = vcombine.high %v94_v42, %v98_v44  ;;  %v86_v51 = vld [vmem:[#allocation5 + $0x58] sm:$0xff]  ;;  %v77_v54 = vld [vmem:[#allocation5 + $0x10] sm:$0xff]  ;;  %v1204_v55 = vcombine.low %v94_v42, %v98_v44  ;;  %v1195_v56 = vcombine.high %v85_v46, %v89_v49  ;;  %v1383_v6 = vld [vmem:[#allocation8 + $0x38] sm:$0xff]  }
  0x3f   :  { %v90_v52 = vld [vmem:[#allocation5 + $0x78] sm:$0xff]  ;;  %v81_v57 = vld [vmem:[#allocation5 + $0x30] sm:$0xff]  ;;  %v1194_v61 = vcombine.low %v85_v46, %v89_v49  ;;  %v1384_v7 = vld [vmem:[#allocation8 + $0xb8] sm:$0xff]  }
  0x40   :  { %v1197_v58 = vcombine.high %v86_v51, %v90_v52  ;;  %v78_v59 = vld [vmem:[#allocation5 + $0x18] sm:$0xff]  ;;  %v1196_v62 = vcombine.low %v86_v51, %v90_v52  ;;  %v1187_v63 = vcombine.high %v77_v54, %v81_v57  ;;  %v1186_v2 = vcombine.low %v77_v54, %v81_v57  ;;  %v1389_v11 = vld [vmem:[#allocation8 + $0x68] sm:$0xff]   ;;  %v1393_v15 = vld [vmem:[#allocation8 + $0x60] sm:$0xff]  }
  0x41   :  { %326 = vmatpush1.bf16.msra.mxu0 %v1190_v27  ;;  %367 = vmatpush1.bf16.msra.mxu1 %v1192_v28  ;;  %v82_v60 = vld [vmem:[#allocation5 + $0x38] sm:$0xff]  ;;  %v1390_v12 = vld [vmem:[#allocation8 + $0xe8] sm:$0xff]   ;;  %v1394_v16 = vld [vmem:[#allocation8 + $0xe0] sm:$0xff]  }
  0x42   :  { %327 = vmatprep.subr.bf16.mxu0 %v1183_v29  ;;  %368 = vmatprep.subr.bf16.mxu1 %v1185_v30  ;;  %v1189_v1 = vcombine.high %v78_v59, %v82_v60  ;;  %v1188_v4 = vcombine.low %v78_v59, %v82_v60  ;;  %v1386_v8 = vld [vmem:[#allocation8 + $0xf0] sm:$0xff]   ;;  %v1391_v13 = vld [vmem:[#allocation8 + $0x28] sm:$0xff]   ;;  %v1395_v17 = vld [vmem:[#allocation8 + $0x20] sm:$0xff]  }
  0x43   :  { %v1387_v9 = vld [vmem:[#allocation8 + $0x30] sm:$0xff]   ;;  %v1392_v14 = vld [vmem:[#allocation8 + $0xa8] sm:$0xff]   ;;  %v1396_v18 = vld [vmem:[#allocation8 + $0xa0] sm:$0xff]  }
  0x44   :  { %v1388_v10 = vld [vmem:[#allocation8 + $0xb0] sm:$0xff]   ;;  %v1397_v19 = vld [vmem:[#allocation8 + $0x58] sm:$0xff]   ;;  %v1405_v27 = vld [vmem:[#allocation8 + $0x48] sm:$0xff]  }
  0x45   :  { %328 = vmatpush1.bf16.msra.mxu0 %v1182_v36  ;;  %369 = vmatpush1.bf16.msra.mxu1 %v1184_v38  ;;  %v1398_v20 = vld [vmem:[#allocation8 + $0xd8] sm:$0xff]   ;;  %v1401_v23 = vld [vmem:[#allocation8 + $0x50] sm:$0xff]   ;;  %v1406_v28 = vld [vmem:[#allocation8 + $0xc8] sm:$0xff]   ;;  %v1613_v38 = vshrl.u32 %v109_v37, 7 }
  0x46   :  { %403 = vmatprep.subr.bf16.mxu0 %v1211_v39  ;;  %444 = vmatprep.subr.bf16.mxu1 %v1213_v41  ;;  %v1399_v21 = vld [vmem:[#allocation8 + $0x18] sm:$0xff]   ;;  %v1402_v24 = vld [vmem:[#allocation8 + $0xd0] sm:$0xff]   ;;  %v1407_v29 = vld [vmem:[#allocation8 + $0x8] sm:$0xff]  }
  0x47   :  { %v1400_v22 = vld [vmem:[#allocation8 + $0x98] sm:$0xff]   ;;  %v1403_v25 = vld [vmem:[#allocation8 + $0x10] sm:$0xff]   ;;  %v1408_v30 = vld [vmem:[#allocation8 + $0x88] sm:$0xff]   ;;  %v111_v39 = vsub.s32 0, %v1613_v38  ;;  %v119_v40 = vsub.s32 2, %v1613_v38  ;;  %v115_v42 = vsub.s32 1, %v1613_v38 }
  0x48   :  { %1214 = vmatmul.mubr.msk.bf16.vlgmr.msra.gmra.mxu0 %vm309_vm0, %v74_v43  ;;  %1215 = vmatmul.mubr.msk.bf16.vlgmr.msra.gmra.mxu1 %vm309_vm0, %v74_v43  ;;  %v1404_v26 = vld [vmem:[#allocation8 + $0x90] sm:$0xff]   ;;  %v1409_v31 = vld [vmem:[#allocation8 + $0x40] sm:$0xff]   ;;  %v1413_v35 = vld [vmem:[#allocation8 + $0x178] sm:$0xff]  }
  0x49   :  { %404 = vmatpush1.bf16.msra.mxu0 %v1210_v45  ;;  %445 = vmatpush1.bf16.msra.mxu1 %v1212_v47  ;;  %v1410_v32 = vld [vmem:[#allocation8 + $0xc0] sm:$0xff]   ;;  %v1414_v36 = vld [vmem:[#allocation8 + $0x1f8] sm:$0xff]   ;;  %v1435_v37 = vld [vmem:[#allocation8 + $0x110] sm:$0xff]  }
  0x4a   :  { %405 = vmatprep.subr.bf16.mxu0 %v1203_v48  ;;  %446 = vmatprep.subr.bf16.mxu1 %v1205_v50  ;;  %v1411_v33 = vld [vmem:[#allocation8] sm:$0xff]   ;;  %v1617_v41 = vld [vmem:[#allocation7] sm:$0xff] }
  0x4b   :  { %427 = vmatprep.mubr.bf16.mxu0 %v1561_v0  ;;  %468 = vmatprep.mubr.bf16.mxu1 %v1561_v0  ;;  %v1385_v0 = vld [vmem:[#allocation8 + $0x70] sm:$0xff]   ;;  %v1412_v34 = vld [vmem:[#allocation8 + $0x80] sm:$0xff]   ;;  %v112_v44 = vrot.slane %v1617_v41, %v111_v39  ;;  %v120_v45 = vrot.slane %v1617_v41, %v119_v40  ;;  %v116_v46 = vrot.slane %v1617_v41, %v115_v42  ;;  %v1415_v60 = vld [vmem:[#allocation8 + $0x138] sm:$0xff]   ;;  %v127_v39 = vsub.s32 4, %v1613_v38 }
  0x4c   :  { %v1436_v40 = vld [vmem:[#allocation8 + $0x190] sm:$0xff]   ;;  %v1437_v42 = vld [vmem:[#allocation8 + $0x148] sm:$0xff]  }
  0x4d   :  { %406 = vmatpush1.bf16.msra.mxu0 %v1202_v53  ;;  %447 = vmatpush1.bf16.msra.mxu1 %v1204_v55 }
  0x4e   :  { %407 = vmatprep.subr.bf16.mxu0 %v1195_v56  ;;  %448 = vmatprep.subr.bf16.mxu1 %v1197_v58 }
  0x51   :  { %408 = vmatpush1.bf16.msra.mxu0 %v1194_v61  ;;  %449 = vmatpush1.bf16.msra.mxu1 %v1196_v62 }
  0x52   :  { %409 = vmatprep.subr.bf16.mxu0 %v1187_v63  ;;  %450 = vmatprep.subr.bf16.mxu1 %v1189_v1  ;;  %v1416_v1 = vld [vmem:[#allocation8 + $0x1b8] sm:$0xff]  }
  0x55   :  { %410 = vmatpush1.bf16.msra.mxu0 %v1186_v2  ;;  %451 = vmatpush1.bf16.msra.mxu1 %v1188_v4  ;;  %v1417_v2 = vld [vmem:[#allocation8 + $0x170] sm:$0xff]  }
  0x56   :  { %1283 = vmatprep.subr.bf16.mxu0 %v1381_v3  ;;  %1305 = vmatprep.subr.bf16.mxu1 %v1382_v5  ;;  %v1418_v4 = vld [vmem:[#allocation8 + $0x1f0] sm:$0xff]  }
  0x57   :  { %v1419_v5 = vld [vmem:[#allocation8 + $0x130] sm:$0xff]  }
  0x58   :  { %1216 = vmatmul.mubr.msk.bf16.vlgmr.msra.gmra.mxu0 %vm309_vm0, %v74_v43  ;;  %1217 = vmatmul.mubr.msk.bf16.vlgmr.msra.gmra.mxu1 %vm309_vm0, %v74_v43  ;;  %v123_v43 = vsub.s32 3, %v1613_v38 }
  0x59   :  { %1284 = vmatpush3.bf16.msra.mxu0 %v1383_v6  ;;  %1306 = vmatpush3.bf16.msra.mxu1 %v1384_v7  ;;  %v1420_v6 = vld [vmem:[#allocation8 + $0x1b0] sm:$0xff]   ;;  %v1421_v7 = vld [vmem:[#allocation8 + $0x168] sm:$0xff]  }
  0x5a   :  { %1285 = vmatprep.subr.bf16.mxu0 %v1385_v0  ;;  %1307 = vmatprep.subr.bf16.mxu1 %v1386_v8  ;;  %v124_v48 = vrot.slane %v1617_v41, %v123_v43  ;;  %v1422_v0 = vld [vmem:[#allocation8 + $0x1e8] sm:$0xff]   ;;  %v131_v8 = vsub.s32 5, %v1613_v38 }
  0x5b   :  { %v1438_v43 = vld [vmem:[#allocation8 + $0x1c8] sm:$0xff]  }
  0x5d   :  { %1286 = vmatpush3.bf16.msra.mxu0 %v1387_v9  ;;  %1308 = vmatpush3.bf16.msra.mxu1 %v1388_v10  ;;  %v139_v9 = vsub.s32 7, %v1613_v38  ;;  %v1423_v10 = vld [vmem:[#allocation8 + $0x128] sm:$0xff]  }
  0x5e   :  { %1287 = vmatprep.subr.bf16.mxu0 %v1389_v11  ;;  %1309 = vmatprep.subr.bf16.mxu1 %v1390_v12  ;;  %v1424_v11 = vld [vmem:[#allocation8 + $0x1a8] sm:$0xff]   ;;  %v1425_v12 = vld [vmem:[#allocation8 + $0x160] sm:$0xff]  }
  0x61   :  { %1288 = vmatpush3.bf16.msra.mxu0 %v1391_v13  ;;  %1310 = vmatpush3.bf16.msra.mxu1 %v1392_v14  ;;  %v1426_v13 = vld [vmem:[#allocation8 + $0x1e0] sm:$0xff]   ;;  %v132_v14 = vrot.slane %v1617_v41, %v131_v8 }
  0x62   :  { %1289 = vmatprep.subr.bf16.mxu0 %v1393_v15  ;;  %1311 = vmatprep.subr.bf16.mxu1 %v1394_v16  ;;  %v140_v16 = vrot.slane %v1617_v41, %v139_v9 }
  0x65   :  { %1290 = vmatpush3.bf16.msra.mxu0 %v1395_v17  ;;  %1312 = vmatpush3.bf16.msra.mxu1 %v1396_v18  ;;  %v1427_v17 = vld [vmem:[#allocation8 + $0x120] sm:$0xff]  }
  0x66   :  { %1291 = vmatprep.subr.bf16.mxu0 %v1397_v19  ;;  %1313 = vmatprep.subr.bf16.mxu1 %v1398_v20  ;;  %v1428_v19 = vld [vmem:[#allocation8 + $0x1a0] sm:$0xff]   ;;  %v1429_v20 = vld [vmem:[#allocation8 + $0x158] sm:$0xff]  }
  0x69   :  { %1292 = vmatpush3.bf16.msra.mxu0 %v1399_v21  ;;  %1314 = vmatpush3.bf16.msra.mxu1 %v1400_v22  ;;  %v1430_v22 = vld [vmem:[#allocation8 + $0x1d8] sm:$0xff]  }
  0x6a   :  { %1293 = vmatprep.subr.bf16.mxu0 %v1401_v23  ;;  %1315 = vmatprep.subr.bf16.mxu1 %v1402_v24 }
  0x6d   :  { %1294 = vmatpush3.bf16.msra.mxu0 %v1403_v25  ;;  %1316 = vmatpush3.bf16.msra.mxu1 %v1404_v26 }
  0x6e   :  { %1295 = vmatprep.subr.bf16.mxu0 %v1405_v27  ;;  %1317 = vmatprep.subr.bf16.mxu1 %v1406_v28  ;;  %v1431_v27 = vld [vmem:[#allocation8 + $0x118] sm:$0xff]  }
  0x71   :  { %1296 = vmatpush3.bf16.msra.mxu0 %v1407_v29  ;;  %1318 = vmatpush3.bf16.msra.mxu1 %v1408_v30  ;;  %v1432_v30 = vld [vmem:[#allocation8 + $0x198] sm:$0xff]  }
  0x72   :  { %1297 = vmatprep.subr.bf16.mxu0 %v1409_v31  ;;  %1319 = vmatprep.subr.bf16.mxu1 %v1410_v32  ;;  %v1433_v31 = vld [vmem:[#allocation8 + $0x150] sm:$0xff]  }
  0x75   :  { %1298 = vmatpush3.bf16.msra.mxu0 %v1411_v33  ;;  %1320 = vmatpush3.bf16.msra.mxu1 %v1412_v34  ;;  %v1434_v34 = vld [vmem:[#allocation8 + $0x1d0] sm:$0xff]  }
  0x76   :  { %1327 = vmatprep.subr.bf16.mxu0 %v1413_v35  ;;  %1349 = vmatprep.subr.bf16.mxu1 %v1414_v36  ;;  %v135_v36 = vsub.s32 6, %v1613_v38  ;;  %v1443_v38 = vld [vmem:[#allocation8 + $0x100] sm:$0xff]  }
 0x108   :  { %v347_v47 = vpop.f32.mrf.mxu0  ;;  %v388_v49 = vpop.f32.mrf.mxu1 }
 0x109   :  { %v348_v50 = vadd.f32 %v347_v47, %v112_v44  ;;  %v389_v51 = vadd.f32 %v388_v49, %v120_v45  ;;  %v136_v44 = vrot.slane %v1617_v41, %v135_v36  ;;  %v1439_v45 = vld [vmem:[#allocation8 + $0x108] sm:$0xff]   ;;  %v1442_v49 = vld [vmem:[#allocation8 + $0x1c0] sm:$0xff]  }
 0x10a   :  { %v349_v52 = vpop.f32.mrf.mxu0  ;;  %v390_v54 = vpop.f32.mrf.mxu1  ;;  %v1440_v47 = vld [vmem:[#allocation8 + $0x188] sm:$0xff]  }
 0x10b   :  { %v350_v53 = vadd.f32 %v349_v52, %v116_v46  ;;  %v391_v55 = vadd.f32 %v390_v54, %v124_v48  ;;  %v479_v57 = vpack.c.bf16 %v389_v51, %v389_v51  ;;  %v477_v61 = vpack.c.bf16 %v348_v50, %v348_v50  ;;  %v1441_v48 = vld [vmem:[#allocation8 + $0x140] sm:$0xff]  }
 0x10c   :  { %v351_v56 = vpop.f32.mrf.mxu0  ;;  %v392_v59 = vpop.f32.mrf.mxu1  ;;  %v128_v46 = vrot.slane %v1617_v41, %v127_v39  ;;  %v1444_v52 = vld [vmem:[#allocation8 + $0x180] sm:$0xff]  }
 0x10d   :  { %v478_v58 = vpack.c.bf16 %v350_v53, %v350_v53  ;;  %v480_v62 = vpack.c.bf16 %v391_v55, %v391_v55 }
 0x10e   :  { %v352_v63 = vpop.f32.mrf.mxu0  ;;  %v393_v3 = vpop.f32.mrf.mxu1 }
 0x10f   :  { %1036 = vmatprep.mubr.bf16.mxu0 %v478_v58  ;;  %1076 = vmatprep.mubr.bf16.mxu1 %v480_v62  ;;  %v1218_v63 = vld [vmem:[%s1643_s4] ss:$0 sm:$0xff]  ;;  %s1525_s4 = scalar_lea.vmem %s1172_s16, 128 }
 0x110   :  { %1037 = vmatmul.mubr.bf16.vlgmr.msra.gmra.mxu0 %v477_v61  ;;  %1077 = vmatmul.mubr.bf16.vlgmr.msra.gmra.mxu1 %v479_v57  ;;  %p1526_p6 = scmp.ne.s32.totalorder %s1172_s16, %s1525_s4  ;;  %p1531_p8 = scmp.lt.s32.totalorder %s1525_s4, %s1525_s4 }
 0x111   :  { %1328 = vmatpush3.bf16.msra.mxu0 %v1415_v60  ;;  %1350 = vmatpush3.bf16.msra.mxu1 %v1416_v1 }
 0x112   :  { %1329 = vmatprep.subr.bf16.mxu0 %v1417_v2  ;;  %1351 = vmatprep.subr.bf16.mxu1 %v1418_v4  ;;  %p1532_p9 = por %p1531_p8, %p1530_p7 }
 0x114   :  { %p1533_p10 = pnand %p1532_p9, %p1526_p6 }
 0x115   :  { %1330 = vmatpush3.bf16.msra.mxu0 %v1419_v5  ;;  %1352 = vmatpush3.bf16.msra.mxu1 %v1420_v6 }
 0x116   :  { %1331 = vmatprep.subr.bf16.mxu0 %v1421_v7  ;;  %1353 = vmatprep.subr.bf16.mxu1 %v1422_v0 }
 0x118   :  { %v429_v15 = vpop.f32.mrf.mxu0  ;;  %v470_v18 = vpop.f32.mrf.mxu1 }
 0x119   :  { %1332 = vmatpush3.bf16.msra.mxu0 %v1423_v10  ;;  %1354 = vmatpush3.bf16.msra.mxu1 %v1424_v11  ;;  %v471_v50 = vadd.f32 %v470_v18, %v136_v44  ;;  %v430_v51 = vadd.f32 %v429_v15, %v128_v46 }
 0x11a   :  { %1333 = vmatprep.subr.bf16.mxu0 %v1425_v12  ;;  %v431_v21 = vpop.f32.mrf.mxu0  ;;  %1355 = vmatprep.subr.bf16.mxu1 %v1426_v13  ;;  %v472_v24 = vpop.f32.mrf.mxu1 }
 0x11b   :  { %v432_v23 = vadd.f32 %v431_v21, %v132_v14  ;;  %v473_v26 = vadd.f32 %v472_v24, %v140_v16  ;;  %v483_v53 = vpack.c.bf16 %v471_v50, %v471_v50  ;;  %v481_v54 = vpack.c.bf16 %v430_v51, %v430_v51 }
 0x11c   :  { %v433_v25 = vpop.f32.mrf.mxu0  ;;  %v474_v29 = vpop.f32.mrf.mxu1 }
 0x11d   :  { %1334 = vmatpush3.bf16.msra.mxu0 %v1427_v17  ;;  %v482_v28 = vpack.c.bf16 %v432_v23, %v432_v23  ;;  %1356 = vmatpush3.bf16.msra.mxu1 %v1428_v19  ;;  %v484_v32 = vpack.c.bf16 %v473_v26, %v473_v26 }
 0x11e   :  { %1335 = vmatprep.subr.bf16.mxu0 %v1429_v20  ;;  %v434_v33 = vpop.f32.mrf.mxu0  ;;  %1357 = vmatprep.subr.bf16.mxu1 %v1430_v22  ;;  %v475_v35 = vpop.f32.mrf.mxu1 }
 0x11f   :  { %1116 = vmatprep.mubr.bf16.mxu0 %v482_v28  ;;  %1156 = vmatprep.mubr.bf16.mxu1 %v484_v32 }
 0x121   :  { %1336 = vmatpush3.bf16.msra.mxu0 %v1431_v27  ;;  %1358 = vmatpush3.bf16.msra.mxu1 %v1432_v30 }
 0x122   :  { %1337 = vmatprep.subr.bf16.mxu0 %v1433_v31  ;;  %1359 = vmatprep.subr.bf16.mxu1 %v1434_v34 }
 0x125   :  { %1338 = vmatpush3.bf16.msra.mxu0 %v1435_v37  ;;  %1360 = vmatpush3.bf16.msra.mxu1 %v1436_v40 }
 0x126   :  { %1339 = vmatprep.subr.bf16.mxu0 %v1437_v42  ;;  %1361 = vmatprep.subr.bf16.mxu1 %v1438_v43 }
 0x129   :  { %1340 = vmatpush3.bf16.msra.mxu0 %v1439_v45  ;;  %1362 = vmatpush3.bf16.msra.mxu1 %v1440_v47 }
 0x12a   :  { %1341 = vmatprep.subr.bf16.mxu0 %v1441_v48  ;;  %1363 = vmatprep.subr.bf16.mxu1 %v1442_v49 }
 0x12d   :  { %1342 = vmatpush3.bf16.msra.mxu0 %v1443_v38  ;;  %1364 = vmatpush3.bf16.msra.mxu1 %v1444_v52 }
 0x130   :  { %1117 = vmatmul.mubr.bf16.vlgmr.msra.gmra.mxu0 %v481_v54  ;;  %1157 = vmatmul.mubr.bf16.vlgmr.msra.gmra.mxu1 %v483_v53 }
 0x1d0   :  { %v1299_v41 = vpop.f32.mrf.mxu0  ;;  %v1321_v55 = vpop.f32.mrf.mxu1 }
 0x1d2   :  { %v1300_v56 = vpop.f32.mrf.mxu0  ;;  %v1322_v57 = vpop.f32.mrf.mxu1 }
 0x1d3   :  { %v1301_v62 = vadd.f32 %v1300_v56, %v1299_v41  ;;  %v1323_v3 = vadd.f32 %v1322_v57, %v1321_v55 }
 0x1d4   :  { %v1302_v58 = vpop.f32.mrf.mxu0  ;;  %v1324_v59 = vpop.f32.mrf.mxu1 }
 0x1d5   :  { %v1039_v1 = vadd.f32 %v1301_v62, %v1218_v63 }
 0x1d6   :  { %v1303_v60 = vpop.f32.mrf.mxu0  ;;  %v1325_v61 = vpop.f32.mrf.mxu1 }
 0x1d7   :  { %v1079_v6 = vadd.f32 %v1323_v3, %v1039_v1 }
 0x1f0   :  { %v1343_v2 = vpop.f32.mrf.mxu0  ;;  %v1365_v4 = vpop.f32.mrf.mxu1 }
 0x1f2   :  { %v1344_v5 = vpop.f32.mrf.mxu0  ;;  %v1366_v0 = vpop.f32.mrf.mxu1 }
 0x1f3   :  { %v1345_v7 = vadd.f32 %v1344_v5, %v1343_v2  ;;  %v1367_v10 = vadd.f32 %v1366_v0, %v1365_v4 }
 0x1f4   :  { %v1346_v8 = vpop.f32.mrf.mxu0  ;;  %v1368_v11 = vpop.f32.mrf.mxu1 }
 0x1f5   :  { %v1119_v9 = vadd.f32 %v1345_v7, %v1079_v6 }
 0x1f6   :  { %v1347_v12 = vpop.f32.mrf.mxu0  ;;  %v1369_v14 = vpop.f32.mrf.mxu1 }
 0x1f7   :  { %v1159_v13 = vadd.f32 %v1367_v10, %v1119_v9 }
 0x1f9   :  { %1164 = vst [vmem:[#allocation10] sm:$0xff] %v1159_v13 }
 0x1fa   :  { %1536 = shalt.err (!%p1533_p10)
}
 0x1fb   :  { %1174 = dma.vmem_to_hbm [thread:$0]  %s1172_s16, 128, %s1644_s5, [#allocation4]  }
 0x1fc   :  { %1551 = dma.done.wait [#allocation4], 128  }
 0x1fd   :  { %1552 = vsyncadd [#allocation4], 4294967168 }
 0x1fe   :  { %1178 = vsyncpa [#allocation3], 1 }
 0x1ff   :  { %1179 = vsyncpa [#allocation6], 1 }
 0x200   :  { %1180 = vsyncpa [#allocation9], 1 }
 0x201   :  { %1181 = vsyncpa [#allocation4], 1 }

</bundles_post_ra>
